<compile_context>
chip_gen: v7x
topology: tpu7x:2x2x1
jax: 0.10.0
libtpu: 0.0.40
codegen_flags: <defaults>
</compile_context>

<pallas_src>
import functools

import jax
import jax.numpy as jnp
from jax.experimental import pallas as pl
from jax.experimental.pallas import tpu as pltpu


def _round_up(x, m):
    return (x + m - 1) // m * m


def _focal_loss_kernel(pred_ref, true_ref, out_ref, acc_ref, *,
                       gamma, alpha, n_elems, tile_elems):
    """Processes one (tile_rows, 128) tile; accumulates into acc_ref (f32 VMEM)."""
    i = pl.program_id(0)
    n_steps = pl.num_programs(0)

    @pl.when(i == 0)
    def _init():
        acc_ref[...] = jnp.zeros_like(acc_ref)

    x = pred_ref[...].astype(jnp.float32)
    y = true_ref[...].astype(jnp.float32)

    # One shared transcendental: e = exp(-|x|) feeds both BCE and sigmoid.
    e = jnp.exp(-jnp.abs(x))
    # Numerically stable BCE-with-logits (valid for soft targets too):
    #   bce = max(x, 0) - x*y + log(1 + exp(-|x|))
    bce = jnp.maximum(x, 0.0) - x * y + jnp.log1p(e)
    # sigmoid(x) = 1/(1+e) for x >= 0, e/(1+e) for x < 0 (single EUP reciprocal).
    inv = pl.reciprocal(1.0 + e, approx=True)
    p = jnp.where(x >= 0.0, inv, e * inv)

    p_t = y * p + (1.0 - y) * (1.0 - p)
    alpha_factor = y * alpha + (1.0 - y) * (1.0 - alpha)
    q = jnp.maximum(1.0 - p_t, 1e-20)        # clamp before pow
    if gamma == 0.0:
        mf = jnp.ones_like(q)
    elif gamma == 1.0:
        mf = q
    elif gamma == 1.5:
        mf = q * jnp.sqrt(q)                 # avoids exp(gamma * log(q))
    elif gamma == 2.0:
        mf = q * q
    else:
        mf = jnp.power(q, gamma)

    loss = bce * alpha_factor * mf

    is_last = i == n_steps - 1

    # Interior tiles: purely elementwise accumulation (no iota/mask, no XLU).
    @pl.when(jnp.logical_not(is_last))
    def _accumulate():
        acc_ref[...] += loss

    # Last tile: mask the padded tail, accumulate, then do the single cross-lane
    # reduction and divide by the unpadded element count.
    @pl.when(is_last)
    def _finalize():
        rows, lanes = loss.shape
        row_idx = jax.lax.broadcasted_iota(jnp.int32, (rows, lanes), 0)
        lane_idx = jax.lax.broadcasted_iota(jnp.int32, (rows, lanes), 1)
        local_idx = row_idx * lanes + lane_idx
        # NOTE: int32 flat index -> fine for tensors with < 2**31 elements.
        base = i * tile_elems
        masked = jnp.where(base + local_idx < n_elems, loss, 0.0)
        acc_ref[...] += masked
        out_ref[0, 0] = jnp.sum(acc_ref[...]) / jnp.float32(n_elems)


def focal_loss(pred, true, gamma=1.5, alpha=0.25, tile_rows=1024):
    """Focal loss with 'mean' reduction. pred/true: same shape, any rank (e.g. NCHW)."""
    assert pred.shape == true.shape
    n_elems = int(pred.size)
    lanes = 128

    # Sublane granularity from the narrowest input dtype (f32: 8, bf16: 16, 8-bit: 32).
    min_itemsize = min(jnp.dtype(pred.dtype).itemsize, jnp.dtype(true.dtype).itemsize)
    sub = max(8, 32 // max(1, min_itemsize))

    rows = pl.cdiv(n_elems, lanes)
    tr = min(_round_up(tile_rows, sub), _round_up(rows, sub))
    rows_padded = _round_up(rows, tr)
    padded = rows_padded * lanes
    n_steps = rows_padded // tr

    # Keep native dtype (cast happens in-kernel); pad only a ragged tail.
    pred_flat = pred.reshape(-1)
    true_flat = true.reshape(-1)
    if padded != n_elems:
        pred_flat = jnp.pad(pred_flat, (0, padded - n_elems))
        true_flat = jnp.pad(true_flat, (0, padded - n_elems))
    pred_2d = pred_flat.reshape(rows_padded, lanes)
    true_2d = true_flat.reshape(rows_padded, lanes)

    kernel = functools.partial(
        _focal_loss_kernel, gamma=float(gamma), alpha=float(alpha),
        n_elems=n_elems, tile_elems=tr * lanes)

    # Working set: 2 inputs x 2 pipeline buffers x tile + f32 accumulator scratch.
    tile_in_bytes = tr * lanes * (jnp.dtype(pred.dtype).itemsize
                                  + jnp.dtype(true.dtype).itemsize)
    vmem_bytes = int(min(64 << 20, max(16 << 20, 4 * tile_in_bytes + 2 * tr * lanes * 4)))

    out = pl.pallas_call(
        kernel,
        out_shape=jax.ShapeDtypeStruct((1, 1), jnp.float32),
        grid_spec=pltpu.PrefetchScalarGridSpec(
            num_scalar_prefetch=0,
            grid=(n_steps,),
            in_specs=[
                pl.BlockSpec((tr, lanes), lambda i: (i, 0)),
                pl.BlockSpec((tr, lanes), lambda i: (i, 0)),
            ],
            out_specs=pl.BlockSpec(memory_space=pltpu.SMEM),
            scratch_shapes=[pltpu.VMEM((tr, lanes), jnp.float32)],
        ),
        compiler_params=pltpu.CompilerParams(
            dimension_semantics=("arbitrary",),
            vmem_limit_bytes=vmem_bytes,
        ),
    )(pred_2d, true_2d)
    return out[0, 0]


def _focal_loss_ref(pred, true, gamma=1.5, alpha=0.25):
    # Pure-JAX reference for validation.
    x = pred.astype(jnp.float32)
    y = true.astype(jnp.float32)
    bce = jnp.maximum(x, 0.0) - x * y + jnp.log1p(jnp.exp(-jnp.abs(x)))
    p = jax.nn.sigmoid(x)
    p_t = y * p + (1 - y) * (1 - p)
    af = y * alpha + (1 - y) * (1 - alpha)
    mf = (1.0 - p_t) ** gamma
    return jnp.mean(bce * af * mf)


if __name__ == "__main__":
    key = jax.random.PRNGKey(0)
    k1, k2, k3, k4 = jax.random.split(key, 4)

    # NCHW-shaped logits and binary targets, as would feed a detection head.
    pred = jax.random.normal(k1, (2, 4, 16, 16), dtype=jnp.float32)
    true = (jax.random.uniform(k2, (2, 4, 16, 16)) > 0.5).astype(jnp.float32)

    ref = _focal_loss_ref(pred, true, gamma=1.5, alpha=0.25)

    # Single-tile path.
    out = jax.block_until_ready(focal_loss(pred, true, gamma=1.5, alpha=0.25))
    assert jnp.allclose(out, ref, rtol=2e-3, atol=1e-5), (out, ref)

    # Multi-tile path (several grid steps feeding the running accumulator).
    out_mt = jax.block_until_ready(
        focal_loss(pred, true, gamma=1.5, alpha=0.25, tile_rows=8))
    assert jnp.allclose(out_mt, ref, rtol=2e-3, atol=1e-5), (out_mt, ref)

    # Ragged element count (tail masking in the last tile).
    pred_r = jax.random.normal(k3, (3, 5, 7), dtype=jnp.float32)
    true_r = (jax.random.uniform(k4, (3, 5, 7)) > 0.5).astype(jnp.float32)
    out_r = jax.block_until_ready(focal_loss(pred_r, true_r))
    ref_r = _focal_loss_ref(pred_r, true_r)
    assert jnp.allclose(out_r, ref_r, rtol=2e-3, atol=1e-5), (out_r, ref_r)

    print("KERNEL_OK")
</pallas_src>

<mosaic_0001>
module attributes {stable_mosaic.version = 11 : i64} {
  func.func @_focal_loss_kernel(%arg0: i32, %arg1: memref<16x128xf32, #tpu.memory_space<vmem>>, %arg2: memref<16x128xf32, #tpu.memory_space<vmem>>, %arg3: memref<1x1xf32, #tpu.memory_space<smem>>, %arg4: memref<16x128xf32, #tpu.memory_space<vmem>>) attributes {dimension_semantics = [#tpu.dimension_semantics<arbitrary>], iteration_bounds = array<i64: 1>, scalar_prefetch = 0 : i64, scratch_operands = 1 : i64, tpu.core_type = #tpu.core_type<tc>, window_params = [{transform_indices = @transform_0, window_bounds = array<i64: 16, 128>}, {transform_indices = @transform_1, window_bounds = array<i64: 16, 128>}, {transform_indices = @transform_2, window_bounds = array<i64: 1, 1>}]} {
    %c0_i32 = arith.constant 0 : i32
    %0 = arith.cmpi eq, %arg0, %c0_i32 : i32
    %1 = arith.extui %0 : i1 to i32
    %c0_i32_0 = arith.constant 0 : i32
    %2 = arith.cmpi ne, %1, %c0_i32_0 : i32
    scf.if %2 {
      %cst_17 = arith.constant 0.000000e+00 : f32
      %50 = vector.broadcast %cst_17 : f32 to vector<16x128xf32>
      %c0_18 = arith.constant 0 : index
      %c0_19 = arith.constant 0 : index
      %51 = vector.load %arg4[%c0_18, %c0_19] : memref<16x128xf32, #tpu.memory_space<vmem>>, vector<16x128xf32>
      tpu.vector_store %arg4[%c0_18, %c0_19], %50 {strides = array<i32>} : memref<16x128xf32, #tpu.memory_space<vmem>>, vector<16x128xf32>,
    } else {
    }
    %c0 = arith.constant 0 : index
    %c0_1 = arith.constant 0 : index
    %3 = vector.load %arg1[%c0, %c0_1] : memref<16x128xf32, #tpu.memory_space<vmem>>, vector<16x128xf32>
    %c0_2 = arith.constant 0 : index
    %c0_3 = arith.constant 0 : index
    %4 = vector.load %arg2[%c0_2, %c0_3] : memref<16x128xf32, #tpu.memory_space<vmem>>, vector<16x128xf32>
    %5 = math.absf %3 : vector<16x128xf32>
    %cst = arith.constant 0.000000e+00 : f32
    %6 = vector.broadcast %cst : f32 to vector<16x128xf32>
    %7 = arith.subf %6, %5 : vector<16x128xf32>
    %8 = math.exp %7 : vector<16x128xf32>
    %cst_4 = arith.constant 0.000000e+00 : f32
    %9 = vector.broadcast %cst_4 : f32 to vector<16x128xf32>
    %10 = arith.maximumf %3, %9 : vector<16x128xf32>
    %11 = arith.mulf %3, %4 : vector<16x128xf32>
    %12 = arith.subf %10, %11 : vector<16x128xf32>
    %13 = math.log1p %8 : vector<16x128xf32>
    %14 = arith.addf %12, %13 : vector<16x128xf32>
    %cst_5 = arith.constant 1.000000e+00 : f32
    %15 = vector.broadcast %cst_5 : f32 to vector<16x128xf32>
    %16 = arith.addf %15, %8 : vector<16x128xf32>
    %17 = tpu.reciprocal %16 {approx = true} : vector<16x128xf32> -> vector<16x128xf32>
    %cst_6 = arith.constant 0.000000e+00 : f32
    %18 = vector.broadcast %cst_6 : f32 to vector<16x128xf32>
    %19 = arith.cmpf oge, %3, %18 : vector<16x128xf32>
    %20 = arith.mulf %8, %17 : vector<16x128xf32>
    %21 = arith.select %19, %17, %20 : vector<16x128xi1>, vector<16x128xf32>
    %22 = arith.mulf %4, %21 : vector<16x128xf32>
    %cst_7 = arith.constant 1.000000e+00 : f32
    %23 = vector.broadcast %cst_7 : f32 to vector<16x128xf32>
    %24 = arith.subf %23, %4 : vector<16x128xf32>
    %cst_8 = arith.constant 1.000000e+00 : f32
    %25 = vector.broadcast %cst_8 : f32 to vector<16x128xf32>
    %26 = arith.subf %25, %21 : vector<16x128xf32>
    %27 = arith.mulf %24, %26 : vector<16x128xf32>
    %28 = arith.addf %22, %27 : vector<16x128xf32>
    %cst_9 = arith.constant 2.500000e-01 : f32
    %29 = vector.broadcast %cst_9 : f32 to vector<16x128xf32>
    %30 = arith.mulf %4, %29 : vector<16x128xf32>
    %cst_10 = arith.constant 1.000000e+00 : f32
    %31 = vector.broadcast %cst_10 : f32 to vector<16x128xf32>
    %32 = arith.subf %31, %4 : vector<16x128xf32>
    %cst_11 = arith.constant 7.500000e-01 : f32
    %33 = vector.broadcast %cst_11 : f32 to vector<16x128xf32>
    %34 = arith.mulf %32, %33 : vector<16x128xf32>
    %35 = arith.addf %30, %34 : vector<16x128xf32>
    %cst_12 = arith.constant 1.000000e+00 : f32
    %36 = vector.broadcast %cst_12 : f32 to vector<16x128xf32>
    %37 = arith.subf %36, %28 : vector<16x128xf32>
    %cst_13 = arith.constant 9.99999968E-21 : f32
    %38 = vector.broadcast %cst_13 : f32 to vector<16x128xf32>
    %39 = arith.maximumf %37, %38 : vector<16x128xf32>
    %40 = math.sqrt %39 : vector<16x128xf32>
    %41 = arith.mulf %39, %40 : vector<16x128xf32>
    %42 = arith.mulf %14, %35 : vector<16x128xf32>
    %43 = arith.mulf %42, %41 : vector<16x128xf32>
    %c0_i32_14 = arith.constant 0 : i32
    %44 = arith.cmpi eq, %arg0, %c0_i32_14 : i32
    %true = arith.constant true
    %45 = arith.xori %44, %true : i1
    %46 = arith.extui %45 : i1 to i32
    %c0_i32_15 = arith.constant 0 : i32
    %47 = arith.cmpi ne, %46, %c0_i32_15 : i32
    scf.if %47 {
      %c0_17 = arith.constant 0 : index
      %c0_18 = arith.constant 0 : index
      %50 = vector.load %arg4[%c0_17, %c0_18] : memref<16x128xf32, #tpu.memory_space<vmem>>, vector<16x128xf32>
      %51 = arith.addf %50, %43 : vector<16x128xf32>
      %c0_19 = arith.constant 0 : index
      %c0_20 = arith.constant 0 : index
      %52 = vector.load %arg4[%c0_19, %c0_20] : memref<16x128xf32, #tpu.memory_space<vmem>>, vector<16x128xf32>
      tpu.vector_store %arg4[%c0_19, %c0_20], %51 {strides = array<i32>} : memref<16x128xf32, #tpu.memory_space<vmem>>, vector<16x128xf32>,
    } else {
    }
    %48 = arith.extui %44 : i1 to i32
    %c0_i32_16 = arith.constant 0 : i32
    %49 = arith.cmpi ne, %48, %c0_i32_16 : i32
    scf.if %49 {
      %50 = tpu.iota {dimensions = array<i32: 0>} : vector<16x128xi32>
      %51 = tpu.iota {dimensions = array<i32: 1>} : vector<16x128xi32>
      %c128_i32 = arith.constant 128 : i32
      %52 = vector.broadcast %c128_i32 : i32 to vector<16x128xi32>
      %53 = arith.muli %50, %52 : vector<16x128xi32>
      %54 = arith.addi %53, %51 : vector<16x128xi32>
      %c2048_i32 = arith.constant 2048 : i32
      %55 = arith.muli %arg0, %c2048_i32 : i32
      %56 = vector.broadcast %55 : i32 to vector<16x128xi32>
      %57 = arith.addi %56, %54 : vector<16x128xi32>
      %c2048_i32_17 = arith.constant 2048 : i32
      %58 = vector.broadcast %c2048_i32_17 : i32 to vector<16x128xi32>
      %59 = arith.cmpi slt, %57, %58 : vector<16x128xi32>
      %cst_18 = arith.constant 0.000000e+00 : f32
      %60 = vector.broadcast %cst_18 : f32 to vector<16x128xf32>
      %61 = arith.select %59, %43, %60 : vector<16x128xi1>, vector<16x128xf32>
      %c0_19 = arith.constant 0 : index
      %c0_20 = arith.constant 0 : index
      %62 = vector.load %arg4[%c0_19, %c0_20] : memref<16x128xf32, #tpu.memory_space<vmem>>, vector<16x128xf32>
      %63 = arith.addf %62, %61 : vector<16x128xf32>
      %c0_21 = arith.constant 0 : index
      %c0_22 = arith.constant 0 : index
      %64 = vector.load %arg4[%c0_21, %c0_22] : memref<16x128xf32, #tpu.memory_space<vmem>>, vector<16x128xf32>
      tpu.vector_store %arg4[%c0_21, %c0_22], %63 {strides = array<i32>} : memref<16x128xf32, #tpu.memory_space<vmem>>, vector<16x128xf32>,
      %c0_23 = arith.constant 0 : index
      %c0_24 = arith.constant 0 : index
      %65 = vector.load %arg4[%c0_23, %c0_24] : memref<16x128xf32, #tpu.memory_space<vmem>>, vector<16x128xf32>
      %66 = vector.shape_cast %65 : vector<16x128xf32> to vector<1x16x128xf32>
      %cst_25 = arith.constant dense<0.000000e+00> : vector<1xf32>
      %67 = vector.multi_reduction <add>, %66, %cst_25 [1, 2] : vector<1x16x128xf32> to vector<1xf32>
      %68 = vector.shape_cast %67 : vector<1xf32> to vector<1x1x1xf32>
      %69 = vector.extract %68[0, 0, 0] : f32 from vector<1x1x1xf32>
      %cst_26 = arith.constant 2.048000e+03 : f32
      %70 = arith.divf %69, %cst_26 : f32
      %c0_27 = arith.constant 0 : index
      %c0_28 = arith.constant 0 : index
      %71 = memref.load %arg3[%c0_27, %c0_28] : memref<1x1xf32, #tpu.memory_space<smem>>
      memref.store %70, %arg3[%c0_27, %c0_28] : memref<1x1xf32, #tpu.memory_space<smem>>
    } else {
    }
    return
  }
  func.func @transform_0(%arg0: i32) -> (i32, i32) {
    %c0_i32 = arith.constant 0 : i32
    %c0_i32_0 = arith.constant 0 : i32
    return %arg0, %c0_i32 : i32, i32
  }
  func.func @transform_1(%arg0: i32) -> (i32, i32) {
    %c0_i32 = arith.constant 0 : i32
    %c0_i32_0 = arith.constant 0 : i32
    return %arg0, %c0_i32 : i32, i32
  }
  func.func @transform_2(%arg0: i32) -> (i32, i32) {
    %c0_i32 = arith.constant 0 : i32
    %c0_i32_0 = arith.constant 0 : i32
    %c0_i32_1 = arith.constant 0 : i32
    return %c0_i32, %c0_i32_0 : i32, i32
  }
}

</mosaic_0001>

<bundles_post_ra>
// kernel: tpu_custom_call.1
= control target key start
LH: loop header
LB: loop body
LE: loop exit
PB: predicated region body
PF: predicated region fallthrough
CT: control target
= control target key end

     0   :  { %7 = vsyncpa [#allocation4], 0  ;;  %s359_s0 = inlined_call_operand.hbm [shape: f32[16,128], index: 0, kind: input, shape index: {}]   ;;  %s360_s1 = inlined_call_operand.hbm [shape: f32[16,128], index: 1, kind: input, shape index: {}]   ;;  %s361_s2 = inlined_call_operand.hbm [shape: f32[1,1], index: 2, kind: output, shape index: {}]  }
   0x1   :  { %8 = vsyncpa [#allocation7], 0 }
   0x2   :  { %9 = vsyncpa [#allocation5], 0  ;;  %s285_s9 = smov [#allocation3]   ;;  %s225_s13 = scalar_lea.hbm %s359_s0, 256 }
   0x3   :  { %s15_s10 = sshll.u32 %s285_s9, 4  ;;  %p226_p0 = scmp.ne.s32.totalorder %s359_s0, %s225_s13  ;;  %s16_s10 = int_to_ptr.vmem [resolvable:$true] %s15_s10 }
   0x4   :  { %p229_p1 = scmp.lt.u32.totalorder %s225_s13, %s359_s0 }
   0x6   :  { %p231_p2 = pnand %p229_p1, %p226_p0 }
   0x8   :  { %234 = shalt.err (!%p231_p2)
}
   0x9   :  { %s235_s18 = scalar_lea.vmem %s16_s10, 256  ;;  %p240_p4 = scmp.lt.s32.totalorder %s16_s10, %s16_s10 }
   0xa   :  { %p236_p3 = scmp.ne.s32.totalorder %s16_s10, %s235_s18  ;;  %p241_p5 = scmp.lt.s32.totalorder %s235_s18, %s235_s18 }
   0xc   :  { %p242_p6 = por %p241_p5, %p240_p4 }
   0xe   :  { %p243_p7 = pnand %p242_p6, %p236_p3 }
  0x10   :  { %246 = shalt.err (!%p243_p7)
}
  0x11   :  { %s286_s19 = smov 128   ;;  %s287_s20 = smov 8  }
  0x12   :  { %21 = dma.hbm_to_vmem [thread:$0]  %s359_s0, 256, %s16_s10, [#allocation4], %s286_s19, %s286_s19, %s287_s20  }
  0x13   :  { %s288_s23 = smov [#allocation6]   ;;  %s247_s27 = scalar_lea.hbm %s360_s1, 256 }
  0x14   :  { %s27_s24 = sshll.u32 %s288_s23, 4  ;;  %p248_p8 = scmp.ne.s32.totalorder %s360_s1, %s247_s27  ;;  %s28_s24 = int_to_ptr.vmem [resolvable:$true] %s27_s24 }
  0x15   :  { %p251_p9 = scmp.lt.u32.totalorder %s247_s27, %s360_s1 }
  0x17   :  { %p253_p10 = pnand %p251_p9, %p248_p8 }
  0x19   :  { %256 = shalt.err (!%p253_p10)
}
  0x1a   :  { %s257_s4 = scalar_lea.vmem %s28_s24, 256  ;;  %p262_p12 = scmp.lt.s32.totalorder %s28_s24, %s28_s24 }
  0x1b   :  { %p258_p11 = scmp.ne.s32.totalorder %s28_s24, %s257_s4  ;;  %p263_p13 = scmp.lt.s32.totalorder %s257_s4, %s257_s4 }
  0x1d   :  { %p264_p0 = por %p263_p13, %p262_p12 }
  0x1f   :  { %p265_p1 = pnand %p264_p0, %p258_p11 }
  0x21   :  { %268 = shalt.err (!%p265_p1)
}
  0x22   :  { %33 = dma.hbm_to_vmem [thread:$0]  %s360_s1, 256, %s28_s24, [#allocation7], %s286_s19, %s286_s19, %s287_s20  }
  0x23   :  { %279 = dma.done.wait [#allocation4], 256  }
  0x24   :  { %280 = vsyncadd [#allocation4], 4294967040 }
  0x25   :  { %281 = dma.done.wait [#allocation7], 256  }
  0x26   :  { %282 = vsyncadd [#allocation7], 4294967040  ;;  %v329_v0 = vld [vmem:[#allocation3] sm:$0xff]  ;;  %v331_v1 = vld [vmem:[#allocation3 + $0x8] sm:$0xff]  ;;  %v147_v34 = vlaneseq  ;;  %s269_s9 = scalar_lea.hbm %s361_s2, 16 }
  0x27   :  { %v50_v2 = vand.u32 2147483647, %v329_v0  ;;  %v51_v3 = vand.u32 2147483647, %v331_v1  ;;  %v48_v12 = vld [vmem:[#allocation6] sm:$0xff]  ;;  %v49_v14 = vld [vmem:[#allocation6 + $0x8] sm:$0xff]  ;;  %p270_p2 = scmp.ne.s32.totalorder %s361_s2, %s269_s9  ;;  %p273_p3 = scmp.lt.u32.totalorder %s269_s9, %s361_s2 }
  0x28   :  { %vm88_vm0 = vcmp.ge.f32.partialorder %v329_v0, 0.0  ;;  %vm89_vm1 = vcmp.ge.f32.partialorder %v331_v1, 0.0  ;;  %v96_v18 = vsub.f32 1.0, %v48_v12  ;;  %v97_v20 = vsub.f32 1.0, %v49_v14 }
  0x29   :  { %v52_v4 = vsub.f32 0.0, %v50_v2  ;;  %v53_v5 = vsub.f32 0.0, %v51_v3  ;;  %v58_v43 = vmax.f32 %v329_v0, 0.0  ;;  %v60_v44 = vmul.f32 %v48_v12, %v329_v0  ;;  %p275_p4 = pnand %p273_p3, %p270_p2 }
  0x2a   :  { %v148_v45 = vshrl.u32 %v147_v34, 7  ;;  %v59_v46 = vmax.f32 %v331_v1, 0.0  ;;  %v61_v47 = vmul.f32 %v49_v14, %v331_v1  ;;  %v104_v54 = vmul.f32 0.25, %v48_v12 }
  0x2b   :  { %v54_v6 = vmul.f32 1.442695, %v52_v4  ;;  %v56_v7 = vmul.f32 1.442695, %v53_v5  ;;  %v62_v53 = vsub.f32 %v58_v43, %v60_v44  ;;  %v106_v55 = vmul.f32 0.75, %v96_v18 }
  0x2c   :  { %v149_v56 = vadd.s32 8, %v148_v45  ;;  %v63_v57 = vsub.f32 %v59_v46, %v61_v47  ;;  %v105_v59 = vmul.f32 0.25, %v49_v14  ;;  %v107_v60 = vmul.f32 0.75, %v97_v20 }
  0x2d   :  { %209 = vpow2.f32 %v54_v6  ;;  %v151_v62 = vand.u32 127, %v147_v34  ;;  %v152_v63 = vmul.u32 128, %v148_v45  ;;  %v108_v1 = vadd.f32 %v106_v55, %v104_v54 }
  0x2e   :  { %211 = vpow2.f32 %v56_v7  ;;  %v153_v2 = vmul.u32 128, %v149_v56  ;;  %v109_v5 = vadd.f32 %v107_v60, %v105_v59 }
  0x37   :  { %v210_v8 = vpop.eup %209 }
  0x38   :  { %v212_v9 = vpop.eup %211  ;;  %v64_v10 = vadd.f32 1.0, %v210_v8  ;;  %v67_v28 = vmul.f32 -0.5, %v210_v8  ;;  %v70_v38 = vand.u32 2147483647, %v210_v8 }
  0x39   :  { %v73_v11 = vadd.f32 1.0, %v212_v9  ;;  %v76_v30 = vmul.f32 -0.5, %v212_v9  ;;  %v79_v42 = vand.u32 2147483647, %v212_v9 }
  0x3a   :  { %213 = vrcp.f32 %v64_v10  ;;  %v68_v35 = vadd.f32 1.0, %v67_v28  ;;  %vm71_vm2 = vcmp.lt.f32.partialorder %v70_v38, 0.0004427343 }
  0x3b   :  { %215 = vrcp.f32 %v73_v11  ;;  %v77_v39 = vadd.f32 1.0, %v76_v30  ;;  %vm341_vm3 = vcmp.lt.f32.partialorder %v79_v42, 0.0004427343 }
  0x3c   :  { %217 = vlog2.f32 %v64_v10  ;;  %v69_v49 = vmul.f32 %v210_v8, %v68_v35 }
  0x3d   :  { %219 = vlog2.f32 %v73_v11  ;;  %v78_v51 = vmul.f32 %v212_v9, %v77_v39  ;;  %v154_v11 = vadd.s32 %v152_v63, %v151_v62 }
  0x3f   :  { %vm160_vm8 = vcmp.lt.s32.totalorder %v154_v11, 2048 }
  0x44   :  { %v214_v13 = vpop.eup %213 }
  0x45   :  { %v216_v15 = vpop.eup %215  ;;  %v90_v16 = vmul.f32 %v214_v13, %v210_v8 }
  0x46   :  { %v91_v17 = vmul.f32 %v216_v15, %v212_v9  ;;  %v218_v37 = vpop.eup %217 }
  0x47   :  { %v92_v19 = vsel %vm88_vm0, %v214_v13, %v90_v16  ;;  %v220_v41 = vpop.eup %219  ;;  %v66_v48 = vmul.f32 0.6931472, %v218_v37 }
  0x48   :  { %v93_v21 = vsel %vm89_vm1, %v216_v15, %v91_v17  ;;  %v94_v22 = vmul.f32 %v92_v19, %v48_v12  ;;  %v98_v23 = vsub.f32 1.0, %v92_v19  ;;  %v75_v50 = vmul.f32 0.6931472, %v220_v41 }
  0x49   :  { %v95_v24 = vmul.f32 %v93_v21, %v49_v14  ;;  %v99_v25 = vsub.f32 1.0, %v93_v21  ;;  %v72_v58 = vsel %vm71_vm2, %v69_v49, %v66_v48  ;;  %v155_v14 = vadd.s32 %v153_v2, %v151_v62 }
  0x4a   :  { %v100_v26 = vmul.f32 %v98_v23, %v96_v18  ;;  %v81_v61 = vsel %vm341_vm3, %v78_v51, %v75_v50  ;;  %v82_v0 = vadd.f32 %v72_v58, %v62_v53 }
  0x4b   :  { %v101_v27 = vmul.f32 %v99_v25, %v97_v20  ;;  %v83_v4 = vadd.f32 %v81_v61, %v63_v57  ;;  %vm161_vm9 = vcmp.lt.s32.totalorder %v155_v14, 2048 }
  0x4c   :  { %v102_v29 = vadd.f32 %v100_v26, %v94_v22  ;;  %v130_v13 = vmul.f32 %v108_v1, %v82_v0 }
  0x4d   :  { %v103_v31 = vadd.f32 %v101_v27, %v95_v24  ;;  %v131_v17 = vmul.f32 %v109_v5, %v83_v4 }
  0x4e   :  { %v110_v32 = vsub.f32 1.0, %v102_v29 }
  0x4f   :  { %v111_v33 = vsub.f32 1.0, %v103_v31 }
  0x50   :  { %v112_v36 = vmax.f32 %v110_v32, 1e-20 }
  0x51   :  { %v113_v40 = vmax.f32 %v111_v33, 1e-20 }
  0x52   :  { %221 = vrsqrt.f32 %v112_v36  ;;  %vm116_vm4 = vcmp.eq.f32.partialorder %v112_v36, inf  ;;  %v119_v6 = vand.u32 2147483648, %v112_v36  ;;  %vm118_vm5 = vcmp.eq.f32.partialorder %v112_v36, 0.0 }
  0x53   :  { %223 = vrsqrt.f32 %v113_v40  ;;  %vm123_vm6 = vcmp.eq.f32.partialorder %v113_v40, inf  ;;  %v126_v9 = vand.u32 2147483648, %v113_v40  ;;  %vm125_vm7 = vcmp.eq.f32.partialorder %v113_v40, 0.0 }
  0x5c   :  { %v222_v3 = vpop.eup %221 }
  0x5d   :  { %v224_v7 = vpop.eup %223  ;;  %v115_v8 = vmul.f32 %v222_v3, %v112_v36 }
  0x5e   :  { %v122_v10 = vmul.f32 %v224_v7, %v113_v40 }
  0x5f   :  { %v117_v12 = vsel %vm116_vm4, %v112_v36, %v115_v8 }
  0x60   :  { %v120_v15 = vsel %vm118_vm5, %v119_v6, %v117_v12  ;;  %v124_v16 = vsel %vm123_vm6, %v113_v40, %v122_v10 }
  0x61   :  { %v127_v18 = vsel %vm125_vm7, %v126_v9, %v124_v16  ;;  %v128_v19 = vmul.f32 %v120_v15, %v112_v36 }
  0x62   :  { %v129_v20 = vmul.f32 %v127_v18, %v113_v40 }
  0x63   :  { %v132_v21 = vmul.f32 %v130_v13, %v128_v19 }
  0x64   :  { %v133_v22 = vmul.f32 %v131_v17, %v129_v20 }
  0x65   :  { %v162_v23 = vsel %vm160_vm8, %v132_v21, 0.0 }
  0x66   :  { %v163_v24 = vsel %vm161_vm9, %v133_v22, 0.0 }
  0x67   :  { %v172_v25 = vadd.f32 %v163_v24, %v162_v23 }
  0x69   :  { %173 = vadd.xlane.f32.xlu0 %v172_v25 }
  0xf6   :  { %v174_v26 = vpop.xlane.xlu0 %173 }
  0xf7   :  { %v175_v27 = vrot.slane %v174_v26, 4 }
  0xf9   :  { %v176_v28 = vadd.f32 %v175_v27, %v174_v26 }
  0xfb   :  { %v177_v29 = vrot.slane %v176_v28, 2 }
  0xfd   :  { %v178_v30 = vadd.f32 %v177_v29, %v176_v28 }
  0xff   :  { %v179_v31 = vrot.slane %v178_v30, 1 }
 0x101   :  { %v180_v32 = vadd.f32 %v179_v31, %v178_v30 }
 0x103   :  { %202 = vpush %v180_v32 }
 0x134   :  { %s203_s1 = spop %202 }
 0x135   :  { %s184_s6 = smul.f32 0.00048828125, %s203_s1 }
 0x137   :  { %186 = sst [smem:[#allocation8]] %s184_s6 }
 0x138   :  { %278 = shalt.err (!%p275_p4)
}
 0x139   :  { %s289_s14 = smov [#allocation8]  }
 0x13a   :  { %194 = dma.smem_to_hbm %s289_s14, 16, %s361_s2, [#allocation5]  }
 0x13b   :  { %283 = dma.done.wait [#allocation5], 16  }
 0x13c   :  { %284 = vsyncadd [#allocation5], 4294967280 }
 0x13d   :  { %198 = sfence }
 0x13e   :  { %199 = vsyncpa [#allocation4], 1 }
 0x13f   :  { %200 = vsyncpa [#allocation7], 1 }
 0x140   :  { %201 = vsyncpa [#allocation5], 1 }

</bundles_post_ra>
